<compile_context>
chip_gen: v7x
topology: tpu7x:2x2x1
jax: 0.10.0
libtpu: 0.0.40
codegen_flags: <defaults>
</compile_context>

<pallas_src>
import numpy as np
import jax
import jax.numpy as jnp
from jax.experimental import pallas as pl
from jax.experimental.pallas import tpu as pltpu

# ---------------- configuration (small, consistent with the module) ----------
FRAME_SIZE = 8                 # frame_size
NODE_EMBED_DIM = 32            # node_embedding_dim == input channels C
NODE_HIDDEN_DIM = 16           # node_hidden_dim
NUM_GNN_LAYERS = 3
NUM_AUX_GRAPHS = 2
CLS_HIDDEN = 16                # classifier_hidden_dim
NUM_OUT_CHANNELS = 4           # num_output_channels
BATCH = 2
BN_EPS = 1e-5

HW = FRAME_SIZE * FRAME_SIZE                                   # 64
AUX_NODES = sum(4 ** g for g in range(1, NUM_AUX_GRAPHS + 1))  # 20
NODES_REAL = AUX_NODES + HW                                    # 84 real nodes / sample
NODES_PAD = 128                # padded node lanes: main 0..63, aux 64..83, zero 84..127
AUX_START = HW                 # aux nodes start at lane 64

# Row offsets inside the packed weight / bias slabs (multiples of 16 -> bf16
# sublane-tile aligned static slices inside the kernel).
_W1_R, _W2_R, _W3_R = 0, 16, 32
_CW1_R, _CW2_R, _CW3_R = 48, 112, 144
_SLAB_ROWS = 160

_SQUEEZED = pl.Squeezed() if hasattr(pl, "Squeezed") else None


# ---------------- the single fused kernel ------------------------------------
def _make_kernel(spp):
    """Kernel processing `spp` samples per grid step (static unroll)."""
    f32, bf16 = jnp.float32, jnp.bfloat16

    def kernel(x_ref, ap_ref, w_ref, b_ref, o_ref):
        a = ap_ref[0:NODES_PAD, :]                          # (128,128) bf16 A_norm (symmetric)
        pool_t = ap_ref[NODES_PAD:NODES_PAD + HW, :]        # (64,128)  bf16 pixels -> nodes

        w1t = w_ref[_W1_R:_W1_R + NODE_HIDDEN_DIM, 0:NODE_EMBED_DIM]       # (16,32)
        w2t = w_ref[_W2_R:_W2_R + NODE_HIDDEN_DIM, 0:NODE_HIDDEN_DIM]      # (16,16)
        w3t = w_ref[_W3_R:_W3_R + NODE_HIDDEN_DIM, 0:NODE_HIDDEN_DIM]      # (16,16)
        cw1t = w_ref[_CW1_R:_CW1_R + 4 * CLS_HIDDEN, 0:NODE_HIDDEN_DIM]    # (64,16)
        cw2t = w_ref[_CW2_R:_CW2_R + 2 * CLS_HIDDEN, 0:4 * CLS_HIDDEN]     # (32,64)
        cw3t = w_ref[_CW3_R:_CW3_R + NUM_OUT_CHANNELS, 0:2 * CLS_HIDDEN]   # (4,32)

        b1 = b_ref[_W1_R:_W1_R + NODE_HIDDEN_DIM, :]        # (16,128) f32, pre-broadcast
        b2 = b_ref[_W2_R:_W2_R + NODE_HIDDEN_DIM, :]
        b3 = b_ref[_W3_R:_W3_R + NODE_HIDDEN_DIM, :]
        cb1 = b_ref[_CW1_R:_CW1_R + 4 * CLS_HIDDEN, 0:HW]   # (64,64)
        cb2 = b_ref[_CW2_R:_CW2_R + 2 * CLS_HIDDEN, 0:HW]   # (32,64)
        cb3 = b_ref[_CW3_R:_CW3_R + NUM_OUT_CHANNELS, 0:HW] # (4,64)

        outs = []
        for s in range(spp):                                # static unroll over samples
            xs = x_ref[...] if spp == 1 else x_ref[s]       # (32, 64) = native (C, H*W)

            # node features (adaptive-avg-pool + identity), features x nodes layout
            ht = jnp.dot(xs.astype(bf16), pool_t, preferred_element_type=f32)   # (32,128)

            # GCN 1 (32 -> 16), BN folded, ReLU; no residual (dims differ)
            z = jnp.dot(w1t, ht.astype(bf16), preferred_element_type=f32)
            z = jnp.dot(z.astype(bf16), a, preferred_element_type=f32) + b1
            ht = jnp.maximum(z, 0.0)

            # GCN 2, BN folded, ReLU, residual
            z = jnp.dot(w2t, ht.astype(bf16), preferred_element_type=f32)
            z = jnp.dot(z.astype(bf16), a, preferred_element_type=f32) + b2
            ht = jnp.maximum(z, 0.0) + ht

            # GCN 3, BN folded, Identity, residual
            z = jnp.dot(w3t, ht.astype(bf16), preferred_element_type=f32)
            z = jnp.dot(z.astype(bf16), a, preferred_element_type=f32) + b3
            ht = z + ht

            # main-graph nodes (node_type == 0) occupy lanes 0..63
            hm = ht[:, 0:HW]                                                     # (16,64)

            # 4 fused per-node classifiers (BN folded, block-diagonal stacking)
            z = jnp.maximum(
                jnp.dot(cw1t, hm.astype(bf16), preferred_element_type=f32) + cb1, 0.0)
            z = jnp.maximum(
                jnp.dot(cw2t, z.astype(bf16), preferred_element_type=f32) + cb2, 0.0)
            z = jnp.dot(cw3t, z.astype(bf16), preferred_element_type=f32) + cb3   # (4,64)
            outs.append(jax.nn.sigmoid(z))

        o_ref[...] = outs[0] if spp == 1 else jnp.concatenate(outs, axis=1)

    return kernel


def _tpu_tensorcores_per_chip():
    try:
        kind = jax.devices()[0].device_kind.lower()
    except Exception:
        return 1
    if "v7" in kind or "7x" in kind:
        return 2
    if ("v4" in kind or "v5p" in kind) and "lite" not in kind:
        return 2          # megacore generations also profit from 2 parallel steps
    return 1


def hierarchical_patch_forward(frames, apool, w_all, b_all, num_steps=None):
    b = frames.shape[0]
    if num_steps is None:
        num_steps = min(b, _tpu_tensorcores_per_chip())
        while num_steps > 1 and b % num_steps:
            num_steps -= 1
    assert b % num_steps == 0
    spp = b // num_steps                                    # samples per grid step

    # native NCHW flatten -> (B, C, H*W); no host-side permute needed in the
    # transposed (features x node-lanes) kernel layout.
    x = frames.reshape(b, NODE_EMBED_DIM, HW)

    def resident(arr):                                      # shared, VMEM-resident constant
        return pl.BlockSpec(arr.shape, lambda i: (0,) * arr.ndim)

    if spp == 1:
        x_spec = pl.BlockSpec((_SQUEEZED, NODE_EMBED_DIM, HW), lambda i: (i, 0, 0))
    else:
        x_spec = pl.BlockSpec((spp, NODE_EMBED_DIM, HW), lambda i: (i, 0, 0))

    flops_per_sample = 2 * (
        NODE_EMBED_DIM * HW * NODES_PAD                      # pooling matmul
        + NODE_HIDDEN_DIM * NODE_EMBED_DIM * NODES_PAD       # W1^T @ hT
        + 2 * NODE_HIDDEN_DIM * NODE_HIDDEN_DIM * NODES_PAD  # W2/W3^T @ hT
        + 3 * NODE_HIDDEN_DIM * NODES_PAD * NODES_PAD        # (.) @ A x3
        + 4 * CLS_HIDDEN * NODE_HIDDEN_DIM * HW
        + 2 * CLS_HIDDEN * 4 * CLS_HIDDEN * HW
        + NUM_OUT_CHANNELS * 2 * CLS_HIDDEN * HW)
    bytes_accessed = (x.size * 4 + apool.size * 2 + w_all.size * 2 + b_all.size * 4
                      + b * HW * NUM_OUT_CHANNELS * 4)

    out = pl.pallas_call(
        _make_kernel(spp),
        out_shape=jax.ShapeDtypeStruct((num_steps, NUM_OUT_CHANNELS, spp * HW), jnp.float32),
        grid=(num_steps,),
        in_specs=[x_spec, resident(apool), resident(w_all), resident(b_all)],
        out_specs=pl.BlockSpec((_SQUEEZED, NUM_OUT_CHANNELS, spp * HW), lambda i: (i, 0, 0)),
        compiler_params=pltpu.CompilerParams(dimension_semantics=("parallel",)),
        cost_estimate=pl.CostEstimate(flops=int(b * flops_per_sample),
                                      transcendentals=int(b * HW * NUM_OUT_CHANNELS),
                                      bytes_accessed=int(bytes_accessed)),
    )(x, apool, w_all, b_all)

    # (steps, 4, spp*64) -> (B*64, 4): rows are sample-major then pixel-major,
    # matching the PyG main-node ordering; .squeeze(1) of the module is a no-op.
    out = out.reshape(num_steps, NUM_OUT_CHANNELS, spp, HW)
    return jnp.transpose(out, (0, 2, 3, 1)).reshape(b * HW, NUM_OUT_CHANNELS)


# ---------------- glue: static graph structure & parameter prep --------------
def _pad_index():
    """Real per-sample node index (aux 0..19, main 20..83) -> padded node lane
    (main first: 0..63, aux: 64..83, zero padding: 84..127)."""
    return np.array([AUX_START + r if r < AUX_NODES else r - AUX_NODES
                     for r in range(NODES_REAL)], np.int32)


def build_pool_matrix_T():
    """(HW, NODES_PAD): flattened pixels -> node features (adaptive-avg-pool
    weights per aux level + identity for the main graph); padded lanes zero."""
    s = np.zeros((NODES_REAL, HW), np.float32)
    row = 0
    for g in range(1, NUM_AUX_GRAPHS + 1):          # adaptive_avg_pool2d -> (2^g, 2^g)
        side = 2 ** g
        k = FRAME_SIZE // side
        for ph in range(side):
            for pw in range(side):
                for dh in range(k):
                    for dw in range(k):
                        s[row, (ph * k + dh) * FRAME_SIZE + (pw * k + dw)] = 1.0 / (k * k)
                row += 1
    for p in range(HW):                             # main graph: identity selection
        s[row + p, p] = 1.0
    pool_t = np.zeros((HW, NODES_PAD), np.float32)
    pool_t[:, _pad_index()] = s.T
    return pool_t


def _grid_edges(side):
    edges = []
    for r in range(side):
        for c in range(side):
            u = r * side + c
            if c + 1 < side:
                edges.append((u, u + 1))
            if r + 1 < side:
                edges.append((u, u + side))
    return edges


def build_sample_graph():
    """Deterministic per-sample hierarchical graph (identical for every sample,
    as in PyG batching of identical structures): 4-neighbor grid edges within
    each aux level and the main graph plus parent-child edges across levels.
    Densified and GCN-normalized on host (scatter over edge_index has no clean
    Pallas equivalent). Returns edge_index, real (84,84) A_norm, padded (128,128)."""
    adj = np.zeros((NODES_REAL, NODES_REAL), np.float32)
    level_off, off = [], 0
    for g in range(1, NUM_AUX_GRAPHS + 1):
        side = 2 ** g
        level_off.append((off, side))
        for (u, v) in _grid_edges(side):
            adj[off + u, off + v] = 1.0
            adj[off + v, off + u] = 1.0
        off += side * side
    level_off.append((off, FRAME_SIZE))             # main graph
    for (u, v) in _grid_edges(FRAME_SIZE):
        adj[off + u, off + v] = 1.0
        adj[off + v, off + u] = 1.0
    for li in range(len(level_off) - 1):            # parent-child (hierarchical patch) edges
        off_p, side_p = level_off[li]
        off_c, side_c = level_off[li + 1]
        k = side_c // side_p
        for r in range(side_c):
            for c in range(side_c):
                p = (r // k) * side_p + (c // k)
                adj[off_p + p, off_c + r * side_c + c] = 1.0
                adj[off_c + r * side_c + c, off_p + p] = 1.0

    edge_index = np.stack(np.nonzero(adj)).astype(np.int32)   # mirrors the PyG input
    a_hat = adj + np.eye(NODES_REAL, dtype=np.float32)
    dinv = 1.0 / np.sqrt(a_hat.sum(1))
    a_norm = (a_hat * dinv[:, None]) * dinv[None, :]

    a_pad = np.zeros((NODES_PAD, NODES_PAD), np.float32)      # padded rows/cols stay zero
    idx = _pad_index()
    a_pad[np.ix_(idx, idx)] = a_norm
    return edge_index, a_norm, a_pad


def init_gcn_params(key):
    """Raw (W, b, gamma, beta, mu, var) per layer + BN-folded (W', b') (exact)."""
    raw, folded = [], []
    din = NODE_EMBED_DIM
    for layer in range(NUM_GNN_LAYERS):
        ks = jax.random.split(jax.random.fold_in(key, 100 + layer), 6)
        w = jax.random.normal(ks[0], (din, NODE_HIDDEN_DIM), jnp.float32) / np.sqrt(din)
        b = 0.1 * jax.random.normal(ks[1], (1, NODE_HIDDEN_DIM), jnp.float32)
        g = 1.0 + 0.1 * jax.random.normal(ks[2], (1, NODE_HIDDEN_DIM), jnp.float32)
        bt = 0.1 * jax.random.normal(ks[3], (1, NODE_HIDDEN_DIM), jnp.float32)
        mu = 0.1 * jax.random.normal(ks[4], (1, NODE_HIDDEN_DIM), jnp.float32)
        var = jax.random.uniform(ks[5], (1, NODE_HIDDEN_DIM), jnp.float32, 0.5, 1.5)
        raw.append((w, b, g, bt, mu, var))
        s = g / jnp.sqrt(var + BN_EPS)
        folded.append((w * s, (b - mu) * s + bt))
        din = NODE_HIDDEN_DIM
    return raw, folded


def init_classifier_params(key):
    raw = []
    for c in range(NUM_OUT_CHANNELS):
        ks = jax.random.split(jax.random.fold_in(key, 200 + c), 14)
        p = dict(
            W1=jax.random.normal(ks[0], (NODE_HIDDEN_DIM, CLS_HIDDEN)) / np.sqrt(NODE_HIDDEN_DIM),
            b1=0.1 * jax.random.normal(ks[1], (CLS_HIDDEN,)),
            g1=1.0 + 0.1 * jax.random.normal(ks[2], (CLS_HIDDEN,)),
            bt1=0.1 * jax.random.normal(ks[3], (CLS_HIDDEN,)),
            m1=0.1 * jax.random.normal(ks[4], (CLS_HIDDEN,)),
            v1=jax.random.uniform(ks[5], (CLS_HIDDEN,), minval=0.5, maxval=1.5),
            W2=jax.random.normal(ks[6], (CLS_HIDDEN, CLS_HIDDEN // 2)) / np.sqrt(CLS_HIDDEN),
            b2=0.1 * jax.random.normal(ks[7], (CLS_HIDDEN // 2,)),
            g2=1.0 + 0.1 * jax.random.normal(ks[8], (CLS_HIDDEN // 2,)),
            bt2=0.1 * jax.random.normal(ks[9], (CLS_HIDDEN // 2,)),
            m2=0.1 * jax.random.normal(ks[10], (CLS_HIDDEN // 2,)),
            v2=jax.random.uniform(ks[11], (CLS_HIDDEN // 2,), minval=0.5, maxval=1.5),
            W3=jax.random.normal(ks[12], (CLS_HIDDEN // 2, 1)) / np.sqrt(CLS_HIDDEN // 2),
            b3=0.1 * jax.random.normal(ks[13], (1,)),
        )
        raw.append(p)

    # Fold eval-mode BN into the preceding Linear (exact), then stack the 4
    # classifiers into wide / block-diagonal weights so one pass does all 4.
    def fold(w, b, g, bt, m, v):
        s = g / jnp.sqrt(v + BN_EPS)
        return w * s[None, :], (b - m) * s + bt

    w1f, b1f, w2f, b2f = [], [], [], []
    for p in raw:
        a, bb = fold(p["W1"], p["b1"], p["g1"], p["bt1"], p["m1"], p["v1"])
        w1f.append(a); b1f.append(bb)
        a, bb = fold(p["W2"], p["b2"], p["g2"], p["bt2"], p["m2"], p["v2"])
        w2f.append(a); b2f.append(bb)
    w1_cat = jnp.concatenate(w1f, axis=1)                          # (16, 64)
    b1_cat = jnp.concatenate(b1f)[None, :]                         # (1, 64)
    w2_blk = jax.scipy.linalg.block_diag(*w2f)                     # (64, 32)
    b2_cat = jnp.concatenate(b2f)[None, :]                         # (1, 32)
    w3_blk = jax.scipy.linalg.block_diag(*[p["W3"] for p in raw])  # (32, 4)
    b3_cat = jnp.concatenate([p["b3"] for p in raw])[None, :]      # (1, 4)
    packed = (w1_cat, b1_cat, w2_blk, b2_cat, w3_blk, b3_cat)
    return raw, packed


def pack_param_slabs(gcn_folded, cls_packed):
    """Pack all (BN-folded) weights into one bf16 slab and all biases into one
    f32 slab (pre-broadcast along node lanes), sliced with static, sublane-
    aligned offsets inside the kernel."""
    (w1, b1), (w2, b2), (w3, b3) = gcn_folded
    cw1, cb1, cw2, cb2, cw3, cb3 = cls_packed

    w_all = np.zeros((_SLAB_ROWS, 64), np.float32)
    b_all = np.zeros((_SLAB_ROWS, NODES_PAD), np.float32)

    def put(r0, w, bvec, b_width):
        wt = np.asarray(w).T                              # transposed: (dout, din)
        w_all[r0:r0 + wt.shape[0], 0:wt.shape[1]] = wt
        col = np.asarray(bvec).reshape(-1)                # (dout,)
        b_all[r0:r0 + col.shape[0], 0:b_width] = col[:, None]

    put(_W1_R, w1, b1, NODES_PAD)
    put(_W2_R, w2, b2, NODES_PAD)
    put(_W3_R, w3, b3, NODES_PAD)
    put(_CW1_R, cw1, cb1, HW)
    put(_CW2_R, cw2, cb2, HW)
    put(_CW3_R, cw3, cb3, HW)
    return jnp.asarray(w_all, jnp.bfloat16), jnp.asarray(b_all, jnp.float32)


# ---------------- pure-JAX reference (unfolded, unpadded, per-sample) ---------
def reference_forward(frames, a_norm_real, gcn_raw, cls_raw):
    outs_all = []
    for i in range(BATCH):
        f = frames[i]
        xs = []
        for g in range(1, NUM_AUX_GRAPHS + 1):
            side = 2 ** g
            k = FRAME_SIZE // side
            pooled = f.reshape(NODE_EMBED_DIM, side, k, side, k).mean(axis=(2, 4))
            xs.append(jnp.transpose(pooled, (1, 2, 0)).reshape(-1, NODE_EMBED_DIM))
        xs.append(jnp.transpose(f, (1, 2, 0)).reshape(-1, NODE_EMBED_DIM))
        h = jnp.concatenate(xs, 0)                              # (84, 32)
        for layer in range(NUM_GNN_LAYERS):
            w, b, g, bt, mu, var = gcn_raw[layer]
            z = a_norm_real @ (h @ w) + b
            z = g * (z - mu) * jax.lax.rsqrt(var + BN_EPS) + bt
            if layer != NUM_GNN_LAYERS - 1:
                z = jnp.maximum(z, 0.0)
            if z.shape[1] == h.shape[1]:
                z = z + h
            h = z
        hm = h[AUX_NODES:]                                      # node_type == 0 (main nodes)
        outs = []
        for p in cls_raw:
            z = hm @ p["W1"] + p["b1"]
            z = p["g1"] * (z - p["m1"]) / jnp.sqrt(p["v1"] + BN_EPS) + p["bt1"]
            z = jnp.maximum(z, 0.0)
            z = z @ p["W2"] + p["b2"]
            z = p["g2"] * (z - p["m2"]) / jnp.sqrt(p["v2"] + BN_EPS) + p["bt2"]
            z = jnp.maximum(z, 0.0)
            z = z @ p["W3"] + p["b3"]
            outs.append(jax.nn.sigmoid(z))
        outs_all.append(jnp.concatenate(outs, axis=1))
    return jnp.concatenate(outs_all, 0)


# ---------------- main ---------------------------------------------------------
if __name__ == "__main__":
    key = jax.random.PRNGKey(0)

    # deterministic inputs: batch of NCHW frames with C == node_embedding_dim
    frames = jax.random.normal(
        jax.random.fold_in(key, 0),
        (BATCH, NODE_EMBED_DIM, FRAME_SIZE, FRAME_SIZE), jnp.float32)

    pool_t = build_pool_matrix_T()
    edge_index, a_norm_real, a_pad = build_sample_graph()  # edge_index mirrors PyG input
    gcn_raw, gcn_folded = init_gcn_params(key)
    cls_raw, cls_packed = init_classifier_params(key)

    # Resident constant slabs: bf16 [A_norm ; pool^T], bf16 packed weights,
    # f32 pre-broadcast biases.  Note: padded node lanes 84..127 only ever see
    # zero adjacency columns, so their bias-driven garbage never reaches real
    # nodes and the main slice (lanes 0..63) excludes them.
    apool = jnp.asarray(np.concatenate([a_pad, pool_t], axis=0), jnp.bfloat16)  # (192, 128)
    w_all, b_all = pack_param_slabs(gcn_folded, cls_packed)

    # TODO(synk): use_coordinate_graph / bilinear_interpolation / connection-node
    # branches are disabled in the default config and are not implemented here.

    out = hierarchical_patch_forward(frames, apool, w_all, b_all)
    out = jax.block_until_ready(out)

    with jax.default_matmul_precision("highest"):
        ref = reference_forward(frames, jnp.asarray(a_norm_real), gcn_raw, cls_raw)
    ref = jax.block_until_ready(ref)

    assert out.shape == (BATCH * HW, NUM_OUT_CHANNELS), out.shape
    assert np.all(np.isfinite(np.asarray(out)))
    max_err = float(np.max(np.abs(np.asarray(out) - np.asarray(ref))))
    assert np.allclose(np.asarray(out), np.asarray(ref), atol=2e-2, rtol=2e-2), max_err

    print("KERNEL_OK")
</pallas_src>

<mosaic_0001>
module attributes {stable_mosaic.version = 11 : i64} {
  func.func @kernel(%arg0: i32, %arg1: memref<2x32x64xf32, #tpu.memory_space<vmem>>, %arg2: memref<192x128xbf16, #tpu.memory_space<vmem>>, %arg3: memref<160x64xbf16, #tpu.memory_space<vmem>>, %arg4: memref<160x128xf32, #tpu.memory_space<vmem>>, %arg5: memref<1x4x128xf32, #tpu.memory_space<vmem>>) attributes {dimension_semantics = [#tpu.dimension_semantics<parallel>], iteration_bounds = array<i64: 1>, scalar_prefetch = 0 : i64, scratch_operands = 0 : i64, tpu.core_type = #tpu.core_type<tc>, window_params = [{transform_indices = @transform_0, window_bounds = array<i64: 2, 32, 64>}, {pipeline_mode = #tpu.pipeline_mode<synchronous>, transform_indices = @transform_1, window_bounds = array<i64: 192, 128>}, {pipeline_mode = #tpu.pipeline_mode<synchronous>, transform_indices = @transform_2, window_bounds = array<i64: 160, 64>}, {pipeline_mode = #tpu.pipeline_mode<synchronous>, transform_indices = @transform_3, window_bounds = array<i64: 160, 128>}, {transform_indices = @transform_4, window_bounds = array<i64: 1, 4, 128>}]} {
    %c0 = arith.constant 0 : index
    %c0_0 = arith.constant 0 : index
    %0 = vector.load %arg2[%c0, %c0_0] : memref<192x128xbf16, #tpu.memory_space<vmem>>, vector<128x128xbf16>
    %c128 = arith.constant 128 : index
    %c0_1 = arith.constant 0 : index
    %1 = vector.load %arg2[%c128, %c0_1] : memref<192x128xbf16, #tpu.memory_space<vmem>>, vector<64x128xbf16>
    %c0_2 = arith.constant 0 : index
    %c0_3 = arith.constant 0 : index
    %2 = vector.load %arg3[%c0_2, %c0_3] : memref<160x64xbf16, #tpu.memory_space<vmem>>, vector<16x32xbf16>
    %c16 = arith.constant 16 : index
    %c0_4 = arith.constant 0 : index
    %3 = vector.load %arg3[%c16, %c0_4] : memref<160x64xbf16, #tpu.memory_space<vmem>>, vector<16x16xbf16>
    %c32 = arith.constant 32 : index
    %c0_5 = arith.constant 0 : index
    %4 = vector.load %arg3[%c32, %c0_5] : memref<160x64xbf16, #tpu.memory_space<vmem>>, vector<16x16xbf16>
    %c48 = arith.constant 48 : index
    %c0_6 = arith.constant 0 : index
    %5 = vector.load %arg3[%c48, %c0_6] : memref<160x64xbf16, #tpu.memory_space<vmem>>, vector<64x16xbf16>
    %c112 = arith.constant 112 : index
    %c0_7 = arith.constant 0 : index
    %6 = vector.load %arg3[%c112, %c0_7] : memref<160x64xbf16, #tpu.memory_space<vmem>>, vector<32x64xbf16>
    %c144 = arith.constant 144 : index
    %c0_8 = arith.constant 0 : index
    %7 = vector.load %arg3[%c144, %c0_8] : memref<160x64xbf16, #tpu.memory_space<vmem>>, vector<4x32xbf16>
    %c0_9 = arith.constant 0 : index
    %c0_10 = arith.constant 0 : index
    %8 = vector.load %arg4[%c0_9, %c0_10] : memref<160x128xf32, #tpu.memory_space<vmem>>, vector<16x128xf32>
    %c16_11 = arith.constant 16 : index
    %c0_12 = arith.constant 0 : index
    %9 = vector.load %arg4[%c16_11, %c0_12] : memref<160x128xf32, #tpu.memory_space<vmem>>, vector<16x128xf32>
    %c32_13 = arith.constant 32 : index
    %c0_14 = arith.constant 0 : index
    %10 = vector.load %arg4[%c32_13, %c0_14] : memref<160x128xf32, #tpu.memory_space<vmem>>, vector<16x128xf32>
    %c48_15 = arith.constant 48 : index
    %c0_16 = arith.constant 0 : index
    %11 = vector.load %arg4[%c48_15, %c0_16] : memref<160x128xf32, #tpu.memory_space<vmem>>, vector<64x64xf32>
    %c112_17 = arith.constant 112 : index
    %c0_18 = arith.constant 0 : index
    %12 = vector.load %arg4[%c112_17, %c0_18] : memref<160x128xf32, #tpu.memory_space<vmem>>, vector<32x64xf32>
    %c144_19 = arith.constant 144 : index
    %c0_20 = arith.constant 0 : index
    %13 = vector.load %arg4[%c144_19, %c0_20] : memref<160x128xf32, #tpu.memory_space<vmem>>, vector<4x64xf32>
    %c0_21 = arith.constant 0 : index
    %c0_22 = arith.constant 0 : index
    %c0_23 = arith.constant 0 : index
    %14 = vector.load %arg1[%c0_21, %c0_22, %c0_23] : memref<2x32x64xf32, #tpu.memory_space<vmem>>, vector<1x32x64xf32>
    %15 = vector.shape_cast %14 : vector<1x32x64xf32> to vector<32x64xf32>
    %16 = arith.truncf %15 : vector<32x64xf32> to vector<32x64xbf16>
    %cst = arith.constant dense<0.000000e+00> : vector<32x128xf32>
    %17 = tpu.matmul %16, %1, %cst {dimension_numbers = #tpu.dot_dimension_numbers<[1], [0], [0], [1], [0, 0, 1, 1], [], []>} : vector<32x64xbf16>, vector<64x128xbf16>, vector<32x128xf32> -> vector<32x128xf32>
    %18 = arith.truncf %17 : vector<32x128xf32> to vector<32x128xbf16>
    %cst_24 = arith.constant dense<0.000000e+00> : vector<16x128xf32>
    %19 = tpu.matmul %2, %18, %cst_24 {dimension_numbers = #tpu.dot_dimension_numbers<[1], [0], [0], [1], [0, 0, 1, 1], [], []>} : vector<16x32xbf16>, vector<32x128xbf16>, vector<16x128xf32> -> vector<16x128xf32>
    %20 = arith.truncf %19 : vector<16x128xf32> to vector<16x128xbf16>
    %cst_25 = arith.constant dense<0.000000e+00> : vector<16x128xf32>
    %21 = tpu.matmul %20, %0, %cst_25 {dimension_numbers = #tpu.dot_dimension_numbers<[1], [0], [0], [1], [0, 0, 1, 1], [], []>} : vector<16x128xbf16>, vector<128x128xbf16>, vector<16x128xf32> -> vector<16x128xf32>
    %22 = arith.addf %21, %8 : vector<16x128xf32>
    %cst_26 = arith.constant 0.000000e+00 : f32
    %23 = vector.broadcast %cst_26 : f32 to vector<16x128xf32>
    %24 = arith.maximumf %22, %23 : vector<16x128xf32>
    %25 = arith.truncf %24 : vector<16x128xf32> to vector<16x128xbf16>
    %cst_27 = arith.constant dense<0.000000e+00> : vector<16x128xf32>
    %26 = tpu.matmul %3, %25, %cst_27 {dimension_numbers = #tpu.dot_dimension_numbers<[1], [0], [0], [1], [0, 0, 1, 1], [], []>} : vector<16x16xbf16>, vector<16x128xbf16>, vector<16x128xf32> -> vector<16x128xf32>
    %27 = arith.truncf %26 : vector<16x128xf32> to vector<16x128xbf16>
    %cst_28 = arith.constant dense<0.000000e+00> : vector<16x128xf32>
    %28 = tpu.matmul %27, %0, %cst_28 {dimension_numbers = #tpu.dot_dimension_numbers<[1], [0], [0], [1], [0, 0, 1, 1], [], []>} : vector<16x128xbf16>, vector<128x128xbf16>, vector<16x128xf32> -> vector<16x128xf32>
    %29 = arith.addf %28, %9 : vector<16x128xf32>
    %cst_29 = arith.constant 0.000000e+00 : f32
    %30 = vector.broadcast %cst_29 : f32 to vector<16x128xf32>
    %31 = arith.maximumf %29, %30 : vector<16x128xf32>
    %32 = arith.addf %31, %24 : vector<16x128xf32>
    %33 = arith.truncf %32 : vector<16x128xf32> to vector<16x128xbf16>
    %cst_30 = arith.constant dense<0.000000e+00> : vector<16x128xf32>
    %34 = tpu.matmul %4, %33, %cst_30 {dimension_numbers = #tpu.dot_dimension_numbers<[1], [0], [0], [1], [0, 0, 1, 1], [], []>} : vector<16x16xbf16>, vector<16x128xbf16>, vector<16x128xf32> -> vector<16x128xf32>
    %35 = arith.truncf %34 : vector<16x128xf32> to vector<16x128xbf16>
    %cst_31 = arith.constant dense<0.000000e+00> : vector<16x128xf32>
    %36 = tpu.matmul %35, %0, %cst_31 {dimension_numbers = #tpu.dot_dimension_numbers<[1], [0], [0], [1], [0, 0, 1, 1], [], []>} : vector<16x128xbf16>, vector<128x128xbf16>, vector<16x128xf32> -> vector<16x128xf32>
    %37 = arith.addf %36, %10 : vector<16x128xf32>
    %38 = arith.addf %37, %32 : vector<16x128xf32>
    %39 = vector.extract_strided_slice %38 {offsets = [0, 0], sizes = [16, 64], strides = [1, 1]} : vector<16x128xf32> to vector<16x64xf32>
    %40 = arith.truncf %39 : vector<16x64xf32> to vector<16x64xbf16>
    %cst_32 = arith.constant dense<0.000000e+00> : vector<64x64xf32>
    %41 = tpu.matmul %5, %40, %cst_32 {dimension_numbers = #tpu.dot_dimension_numbers<[1], [0], [0], [1], [0, 0, 1, 1], [], []>} : vector<64x16xbf16>, vector<16x64xbf16>, vector<64x64xf32> -> vector<64x64xf32>
    %42 = arith.addf %41, %11 : vector<64x64xf32>
    %cst_33 = arith.constant 0.000000e+00 : f32
    %43 = vector.broadcast %cst_33 : f32 to vector<64x64xf32>
    %44 = arith.maximumf %42, %43 : vector<64x64xf32>
    %45 = arith.truncf %44 : vector<64x64xf32> to vector<64x64xbf16>
    %cst_34 = arith.constant dense<0.000000e+00> : vector<32x64xf32>
    %46 = tpu.matmul %6, %45, %cst_34 {dimension_numbers = #tpu.dot_dimension_numbers<[1], [0], [0], [1], [0, 0, 1, 1], [], []>} : vector<32x64xbf16>, vector<64x64xbf16>, vector<32x64xf32> -> vector<32x64xf32>
    %47 = arith.addf %46, %12 : vector<32x64xf32>
    %cst_35 = arith.constant 0.000000e+00 : f32
    %48 = vector.broadcast %cst_35 : f32 to vector<32x64xf32>
    %49 = arith.maximumf %47, %48 : vector<32x64xf32>
    %50 = arith.truncf %49 : vector<32x64xf32> to vector<32x64xbf16>
    %cst_36 = arith.constant dense<0.000000e+00> : vector<4x64xf32>
    %51 = tpu.matmul %7, %50, %cst_36 {dimension_numbers = #tpu.dot_dimension_numbers<[1], [0], [0], [1], [0, 0, 1, 1], [], []>} : vector<4x32xbf16>, vector<32x64xbf16>, vector<4x64xf32> -> vector<4x64xf32>
    %52 = arith.addf %51, %13 : vector<4x64xf32>
    %53 = arith.negf %52 : vector<4x64xf32>
    %54 = math.exp %53 : vector<4x64xf32>
    %cst_37 = arith.constant 1.000000e+00 : f32
    %55 = vector.broadcast %cst_37 : f32 to vector<4x64xf32>
    %56 = arith.addf %55, %54 : vector<4x64xf32>
    %57 = arith.divf %55, %56 : vector<4x64xf32>
    %c1 = arith.constant 1 : index
    %c0_38 = arith.constant 0 : index
    %c0_39 = arith.constant 0 : index
    %58 = vector.load %arg1[%c1, %c0_38, %c0_39] : memref<2x32x64xf32, #tpu.memory_space<vmem>>, vector<1x32x64xf32>
    %59 = vector.shape_cast %58 : vector<1x32x64xf32> to vector<32x64xf32>
    %60 = arith.truncf %59 : vector<32x64xf32> to vector<32x64xbf16>
    %cst_40 = arith.constant dense<0.000000e+00> : vector<32x128xf32>
    %61 = tpu.matmul %60, %1, %cst_40 {dimension_numbers = #tpu.dot_dimension_numbers<[1], [0], [0], [1], [0, 0, 1, 1], [], []>} : vector<32x64xbf16>, vector<64x128xbf16>, vector<32x128xf32> -> vector<32x128xf32>
    %62 = arith.truncf %61 : vector<32x128xf32> to vector<32x128xbf16>
    %cst_41 = arith.constant dense<0.000000e+00> : vector<16x128xf32>
    %63 = tpu.matmul %2, %62, %cst_41 {dimension_numbers = #tpu.dot_dimension_numbers<[1], [0], [0], [1], [0, 0, 1, 1], [], []>} : vector<16x32xbf16>, vector<32x128xbf16>, vector<16x128xf32> -> vector<16x128xf32>
    %64 = arith.truncf %63 : vector<16x128xf32> to vector<16x128xbf16>
    %cst_42 = arith.constant dense<0.000000e+00> : vector<16x128xf32>
    %65 = tpu.matmul %64, %0, %cst_42 {dimension_numbers = #tpu.dot_dimension_numbers<[1], [0], [0], [1], [0, 0, 1, 1], [], []>} : vector<16x128xbf16>, vector<128x128xbf16>, vector<16x128xf32> -> vector<16x128xf32>
    %66 = arith.addf %65, %8 : vector<16x128xf32>
    %cst_43 = arith.constant 0.000000e+00 : f32
    %67 = vector.broadcast %cst_43 : f32 to vector<16x128xf32>
    %68 = arith.maximumf %66, %67 : vector<16x128xf32>
    %69 = arith.truncf %68 : vector<16x128xf32> to vector<16x128xbf16>
    %cst_44 = arith.constant dense<0.000000e+00> : vector<16x128xf32>
    %70 = tpu.matmul %3, %69, %cst_44 {dimension_numbers = #tpu.dot_dimension_numbers<[1], [0], [0], [1], [0, 0, 1, 1], [], []>} : vector<16x16xbf16>, vector<16x128xbf16>, vector<16x128xf32> -> vector<16x128xf32>
    %71 = arith.truncf %70 : vector<16x128xf32> to vector<16x128xbf16>
    %cst_45 = arith.constant dense<0.000000e+00> : vector<16x128xf32>
    %72 = tpu.matmul %71, %0, %cst_45 {dimension_numbers = #tpu.dot_dimension_numbers<[1], [0], [0], [1], [0, 0, 1, 1], [], []>} : vector<16x128xbf16>, vector<128x128xbf16>, vector<16x128xf32> -> vector<16x128xf32>
    %73 = arith.addf %72, %9 : vector<16x128xf32>
    %cst_46 = arith.constant 0.000000e+00 : f32
    %74 = vector.broadcast %cst_46 : f32 to vector<16x128xf32>
    %75 = arith.maximumf %73, %74 : vector<16x128xf32>
    %76 = arith.addf %75, %68 : vector<16x128xf32>
    %77 = arith.truncf %76 : vector<16x128xf32> to vector<16x128xbf16>
    %cst_47 = arith.constant dense<0.000000e+00> : vector<16x128xf32>
    %78 = tpu.matmul %4, %77, %cst_47 {dimension_numbers = #tpu.dot_dimension_numbers<[1], [0], [0], [1], [0, 0, 1, 1], [], []>} : vector<16x16xbf16>, vector<16x128xbf16>, vector<16x128xf32> -> vector<16x128xf32>
    %79 = arith.truncf %78 : vector<16x128xf32> to vector<16x128xbf16>
    %cst_48 = arith.constant dense<0.000000e+00> : vector<16x128xf32>
    %80 = tpu.matmul %79, %0, %cst_48 {dimension_numbers = #tpu.dot_dimension_numbers<[1], [0], [0], [1], [0, 0, 1, 1], [], []>} : vector<16x128xbf16>, vector<128x128xbf16>, vector<16x128xf32> -> vector<16x128xf32>
    %81 = arith.addf %80, %10 : vector<16x128xf32>
    %82 = arith.addf %81, %76 : vector<16x128xf32>
    %83 = vector.extract_strided_slice %82 {offsets = [0, 0], sizes = [16, 64], strides = [1, 1]} : vector<16x128xf32> to vector<16x64xf32>
    %84 = arith.truncf %83 : vector<16x64xf32> to vector<16x64xbf16>
    %cst_49 = arith.constant dense<0.000000e+00> : vector<64x64xf32>
    %85 = tpu.matmul %5, %84, %cst_49 {dimension_numbers = #tpu.dot_dimension_numbers<[1], [0], [0], [1], [0, 0, 1, 1], [], []>} : vector<64x16xbf16>, vector<16x64xbf16>, vector<64x64xf32> -> vector<64x64xf32>
    %86 = arith.addf %85, %11 : vector<64x64xf32>
    %cst_50 = arith.constant 0.000000e+00 : f32
    %87 = vector.broadcast %cst_50 : f32 to vector<64x64xf32>
    %88 = arith.maximumf %86, %87 : vector<64x64xf32>
    %89 = arith.truncf %88 : vector<64x64xf32> to vector<64x64xbf16>
    %cst_51 = arith.constant dense<0.000000e+00> : vector<32x64xf32>
    %90 = tpu.matmul %6, %89, %cst_51 {dimension_numbers = #tpu.dot_dimension_numbers<[1], [0], [0], [1], [0, 0, 1, 1], [], []>} : vector<32x64xbf16>, vector<64x64xbf16>, vector<32x64xf32> -> vector<32x64xf32>
    %91 = arith.addf %90, %12 : vector<32x64xf32>
    %cst_52 = arith.constant 0.000000e+00 : f32
    %92 = vector.broadcast %cst_52 : f32 to vector<32x64xf32>
    %93 = arith.maximumf %91, %92 : vector<32x64xf32>
    %94 = arith.truncf %93 : vector<32x64xf32> to vector<32x64xbf16>
    %cst_53 = arith.constant dense<0.000000e+00> : vector<4x64xf32>
    %95 = tpu.matmul %7, %94, %cst_53 {dimension_numbers = #tpu.dot_dimension_numbers<[1], [0], [0], [1], [0, 0, 1, 1], [], []>} : vector<4x32xbf16>, vector<32x64xbf16>, vector<4x64xf32> -> vector<4x64xf32>
    %96 = arith.addf %95, %13 : vector<4x64xf32>
    %97 = arith.negf %96 : vector<4x64xf32>
    %98 = math.exp %97 : vector<4x64xf32>
    %cst_54 = arith.constant 1.000000e+00 : f32
    %99 = vector.broadcast %cst_54 : f32 to vector<4x64xf32>
    %100 = arith.addf %99, %98 : vector<4x64xf32>
    %101 = arith.divf %99, %100 : vector<4x64xf32>
    %102 = tpu.concatenate %57, %101 in 1 : vector<4x64xf32>, vector<4x64xf32> -> vector<4x128xf32>
    %c0_55 = arith.constant 0 : index
    %c0_56 = arith.constant 0 : index
    %c0_57 = arith.constant 0 : index
    %103 = vector.load %arg5[%c0_55, %c0_56, %c0_57] : memref<1x4x128xf32, #tpu.memory_space<vmem>>, vector<1x4x128xf32>
    %104 = vector.shape_cast %103 : vector<1x4x128xf32> to vector<4x128xf32>
    %105 = vector.shape_cast %102 : vector<4x128xf32> to vector<1x4x128xf32>
    tpu.vector_store %arg5[%c0_55, %c0_56, %c0_57], %105 {strides = array<i32>} : memref<1x4x128xf32, #tpu.memory_space<vmem>>, vector<1x4x128xf32>,
    return
  }
  func.func @transform_0(%arg0: i32) -> (i32, i32, i32) {
    %c0_i32 = arith.constant 0 : i32
    %c0_i32_0 = arith.constant 0 : i32
    %c0_i32_1 = arith.constant 0 : i32
    return %arg0, %c0_i32, %c0_i32_0 : i32, i32, i32
  }
  func.func @transform_1(%arg0: i32) -> (i32, i32) {
    %c0_i32 = arith.constant 0 : i32
    %c0_i32_0 = arith.constant 0 : i32
    %c0_i32_1 = arith.constant 0 : i32
    return %c0_i32, %c0_i32_0 : i32, i32
  }
  func.func @transform_2(%arg0: i32) -> (i32, i32) {
    %c0_i32 = arith.constant 0 : i32
    %c0_i32_0 = arith.constant 0 : i32
    %c0_i32_1 = arith.constant 0 : i32
    return %c0_i32, %c0_i32_0 : i32, i32
  }
  func.func @transform_3(%arg0: i32) -> (i32, i32) {
    %c0_i32 = arith.constant 0 : i32
    %c0_i32_0 = arith.constant 0 : i32
    %c0_i32_1 = arith.constant 0 : i32
    return %c0_i32, %c0_i32_0 : i32, i32
  }
  func.func @transform_4(%arg0: i32) -> (i32, i32, i32) {
    %c0_i32 = arith.constant 0 : i32
    %c0_i32_0 = arith.constant 0 : i32
    %c0_i32_1 = arith.constant 0 : i32
    return %arg0, %c0_i32, %c0_i32_0 : i32, i32, i32
  }
}

</mosaic_0001>

<bundles_post_ra>
// kernel: tpu_custom_call.1
= control target key start
LH: loop header
LB: loop body
LE: loop exit
PB: predicated region body
PF: predicated region fallthrough
CT: control target
= control target key end

     0   :  { %9 = vsyncpa [#allocation3], 0  ;;  %s2243_s0 = inlined_call_operand.hbm [shape: f32[2,32,64], index: 0, kind: input, shape index: {}]   ;;  %s2244_s1 = inlined_call_operand.vmem [shape: bf16[192,128], index: 1, kind: input, shape index: {}]   ;;  %s2245_s2 = inlined_call_operand.vmem [shape: bf16[160,64], index: 2, kind: input, shape index: {}]   ;;  %s2246_s3 = inlined_call_operand.hbm [shape: f32[160,128], index: 3, kind: input, shape index: {}]   ;;  %s2247_s4 = inlined_call_operand.hbm [shape: f32[1,4,128], index: 4, kind: output, shape index: {}]  }
   0x1   :  { %10 = vsyncpa [#allocation6], 0 }
   0x2   :  { %11 = vsyncpa [#allocation4], 0  ;;  %s1792_s15 = smov [#allocation2]   ;;  %s1720_s19 = scalar_lea.hbm %s2243_s0, 1024 }
   0x3   :  { %s17_s16 = sshll.u32 %s1792_s15, 4  ;;  %p1721_p0 = scmp.ne.s32.totalorder %s2243_s0, %s1720_s19  ;;  %s18_s16 = int_to_ptr.vmem [resolvable:$true] %s17_s16 }
   0x4   :  { %p1724_p1 = scmp.lt.u32.totalorder %s1720_s19, %s2243_s0 }
   0x6   :  { %p1726_p2 = pnand %p1724_p1, %p1721_p0 }
   0x8   :  { %1729 = shalt.err (!%p1726_p2)
}
   0x9   :  { %s1730_s24 = scalar_lea.vmem %s18_s16, 1024  ;;  %p1735_p4 = scmp.lt.s32.totalorder %s18_s16, %s18_s16 }
   0xa   :  { %p1731_p3 = scmp.ne.s32.totalorder %s18_s16, %s1730_s24  ;;  %p1736_p5 = scmp.lt.s32.totalorder %s1730_s24, %s1730_s24 }
   0xc   :  { %p1737_p6 = por %p1736_p5, %p1735_p4 }
   0xe   :  { %p1738_p7 = pnand %p1737_p6, %p1731_p3 }
  0x10   :  { %1741 = shalt.err (!%p1738_p7)
}
  0x11   :  { %s1793_s25 = smov 128   ;;  %s1794_s26 = smov 8  }
  0x12   :  { %23 = dma.hbm_to_vmem [thread:$0]  %s2243_s0, 1024, %s18_s16, [#allocation3], %s1793_s25, %s1793_s25, %s1794_s26  }
  0x13   :  { %s1795_s29 = smov [#allocation5]   ;;  %s1742_s7 = scalar_lea.hbm %s2246_s3, 2560 }
  0x14   :  { %s33_s30 = sshll.u32 %s1795_s29, 4  ;;  %p1743_p8 = scmp.ne.s32.totalorder %s2246_s3, %s1742_s7  ;;  %s34_s30 = int_to_ptr.vmem [resolvable:$true] %s33_s30 }
  0x15   :  { %p1746_p9 = scmp.lt.u32.totalorder %s1742_s7, %s2246_s3 }
  0x17   :  { %p1748_p10 = pnand %p1746_p9, %p1743_p8 }
  0x19   :  { %1751 = shalt.err (!%p1748_p10)
}
  0x1a   :  { %s1752_s12 = scalar_lea.vmem %s34_s30, 2560  ;;  %p1757_p12 = scmp.lt.s32.totalorder %s34_s30, %s34_s30 }
  0x1b   :  { %p1753_p11 = scmp.ne.s32.totalorder %s34_s30, %s1752_s12  ;;  %p1758_p13 = scmp.lt.s32.totalorder %s1752_s12, %s1752_s12 }
  0x1d   :  { %p1759_p0 = por %p1758_p13, %p1757_p12 }
  0x1f   :  { %p1760_p1 = pnand %p1759_p0, %p1753_p11 }
  0x21   :  { %1763 = shalt.err (!%p1760_p1)
}
  0x22   :  { %39 = dma.hbm_to_vmem [thread:$0]  %s2246_s3, 2560, %s34_s30, [#allocation6], %s1793_s25, %s1793_s25, %s1794_s26  }
  0x23   :  { %1786 = dma.done.wait [#allocation3], 1024  }
  0x24   :  { %1787 = vsyncadd [#allocation3], 4294966272 }
  0x25   :  { %1788 = dma.done.wait [#allocation6], 2560  }
  0x26   :  { %1789 = vsyncadd [#allocation6], 4294964736  ;;  %v1852_v0 = vld [vmem:[%s2244_s1 + $0x40] sm:$0xff]   ;;  %v1857_v1 = vld [vmem:[%s2244_s1 + $0x48] sm:$0xff]   ;;  %vm139_vm0 = vcmask 523264   ;;  %v1796_v10 = vmov 0.0  }
  0x27   :  { %1439 = vmatprep.subr.bf16.mxu0 %v1852_v0  ;;  %v1865_v2 = vld [vmem:[%s2244_s1 + $0x50] sm:$0xff]   ;;  %v109_v3 = vld [vmem:[#allocation2] sm:$0xff]  ;;  %v110_v4 = vld [vmem:[#allocation2 + $0x8] sm:$0xff]  ;;  %1451 = vmatprep.subr.bf16.mxu1 %v1796_v10  ;;  %vm1797_vm1 = vmmov 0   ;;  %vm202_vm2 = vcmask 261120   ;;  %vm345_vm3 = vcmask 130048  }
  0x28   :  { %1440 = vmatpush3.bf16.msra.mxu0 %v1852_v0  ;;  %v113_v5 = vpack.c.bf16 %v110_v4, %v109_v3  ;;  %v1870_v6 = vld [vmem:[%s2244_s1 + $0x58] sm:$0xff]   ;;  %v111_v7 = vld [vmem:[#allocation2 + $0x10] sm:$0xff]  ;;  %1455 = vmatprep.mubr.msk.bf16.mxu1 %vm1797_vm1, %v1796_v10  ;;  %v1889_v17 = vld [vmem:[%s2245_s2] sm:$0xff]   ;;  %s1799_s28 = smov [#allocation7]  }
  0x29   :  { %1441 = vmatprep.subr.bf16.mxu0 %v1857_v1  ;;  %v112_v8 = vld [vmem:[#allocation2 + $0x18] sm:$0xff]  ;;  %v1894_v18 = vld [vmem:[%s2244_s1] sm:$0xff]   ;;  %v1903_v19 = vld [vmem:[%s2244_s1 + $0x8] sm:$0xff]   ;;  %s1274_s29 = sshll.u32 %s1799_s28, 4  ;;  %s1275_s29 = int_to_ptr.vmem [resolvable:$true] %s1274_s29 }
  0x2a   :  { %1447 = vmatprep.mubr.msk.bf16.mxu0 %vm139_vm0, %v113_v5  ;;  %v114_v9 = vpack.c.bf16 %v112_v8, %v111_v7  ;;  %v1912_v20 = vld [vmem:[%s2244_s1 + $0x10] sm:$0xff]   ;;  %v1919_v21 = vld [vmem:[%s2244_s1 + $0x18] sm:$0xff]   ;;  %v1926_v22 = vld [vmem:[%s2244_s1 + $0x20] sm:$0xff]   ;;  %s1764_s30 = scalar_lea.vmem %s1275_s29, 64  ;;  %p1769_p3 = scmp.lt.s32.totalorder %s1275_s29, %s1275_s29 }
  0x2b   :  { %v1933_v23 = vld [vmem:[%s2244_s1 + $0x28] sm:$0xff]   ;;  %v1940_v24 = vld [vmem:[%s2244_s1 + $0x30] sm:$0xff]   ;;  %v1948_v25 = vld [vmem:[%s2244_s1 + $0x38] sm:$0xff]   ;;  %p1765_p2 = scmp.ne.s32.totalorder %s1275_s29, %s1764_s30  ;;  %p1770_p4 = scmp.lt.s32.totalorder %s1764_s30, %s1764_s30 }
  0x2c   :  { %1442 = vmatpush3.bf16.msra.mxu0 %v1857_v1  ;;  %v1954_v31 = vld [vmem:[#allocation5] sm:$0xff]  ;;  %v1956_v33 = vld [vmem:[#allocation5 + $0x8] sm:$0xff]  ;;  %v1985_v48 = vld [vmem:[#allocation5 + $0x10] sm:$0xff] }
  0x2d   :  { %1443 = vmatprep.subr.bf16.mxu0 %v1865_v2  ;;  %v1963_v42 = vld [vmem:[%s2245_s2 + $0x8] sm:$0xff]   ;;  %v1987_v50 = vld [vmem:[#allocation5 + $0x18] sm:$0xff]  ;;  %v1994_v61 = vld [vmem:[%s2245_s2 + $0x10] sm:$0xff]   ;;  %p1771_p5 = por %p1770_p4, %p1769_p3 }
  0x2e   :  { %v2028_v7 = vld [vmem:[%s2245_s2 + $0x18] sm:$0xff]   ;;  %v2034_v8 = vld [vmem:[#allocation5 + $0x28] sm:$0xff] }
  0x2f   :  { %p1772_p6 = pnand %p1771_p5, %p1765_p2 }
  0x30   :  { %1444 = vmatpush3.bf16.msra.mxu0 %v1865_v2 }
  0x31   :  { %1445 = vmatprep.subr.bf16.mxu0 %v1870_v6 }
  0x34   :  { %1446 = vmatpush3.bf16.msra.mxu0 %v1870_v6 }
  0x35   :  { %1479 = vmatprep.subr.bf16.mxu0 %v1796_v10 }
  0x37   :  { %1448 = vmatmul.mubr.msk.bf16.vlgmr.msra.gmra.mrb[0].mxu0 %vm139_vm0, %v114_v9 }
  0x38   :  { %1481 = vmatprep.mubr.msk.bf16.mxu0 %vm1797_vm1, %v1796_v10 }
 0x10a   :  { %v1449_v11 = vpop.f32.mrb[0].mxu0 }
 0x10b   :  { %v180_v12 = vpop.f32.mrb[1].mxu0 }
 0x10c   :  { %v1450_v13 = vpop.f32.mrb[2].mxu0 }
 0x10d   :  { %v196_v14 = vpack.c.bf16 %v1450_v13, %v1449_v11  ;;  %v183_v15 = vpop.f32.mrb[3].mxu0 }
 0x10e   :  { %v195_v16 = vpack.c.bf16 %v183_v15, %v180_v12 }
 0x110   :  { %1452 = vmatpush3.bf16.msra.mxu1 %v195_v16  ;;  %v2041_v16 = vld [vmem:[%s2245_s2 + $0x20] sm:$0xff]  }
 0x111   :  { %1453 = vmatprep.subr.bf16.mxu1 %v1796_v10 }
 0x114   :  { %1454 = vmatpush3.bf16.msra.mxu1 %v196_v14 }
 0x115   :  { %1459 = vmatprep.subr.bf16.mxu1 %v1796_v10 }
 0x117   :  { %1456 = vmatmul.mubr.msk.bf16.vlgmr.msra.gmra.mrb[0].mxu1 %vm202_vm2, %v1889_v17 }
 0x118   :  { %1460 = vmatpush3.bf16.msra.mxu1 %v1894_v18  ;;  %1475 = vmatprep.mubr.msk.bf16.mxu1 %vm1797_vm1, %v1796_v10 }
 0x119   :  { %1461 = vmatprep.subr.bf16.mxu1 %v1796_v10 }
 0x11c   :  { %1462 = vmatpush3.bf16.msra.mxu1 %v1903_v19 }
 0x11d   :  { %1463 = vmatprep.subr.bf16.mxu1 %v1796_v10 }
 0x120   :  { %1464 = vmatpush3.bf16.msra.mxu1 %v1912_v20 }
 0x121   :  { %1465 = vmatprep.subr.bf16.mxu1 %v1796_v10 }
 0x124   :  { %1466 = vmatpush3.bf16.msra.mxu1 %v1919_v21 }
 0x125   :  { %1467 = vmatprep.subr.bf16.mxu1 %v1796_v10 }
 0x128   :  { %1468 = vmatpush3.bf16.msra.mxu1 %v1926_v22 }
 0x129   :  { %1469 = vmatprep.subr.bf16.mxu1 %v1796_v10 }
 0x12c   :  { %1470 = vmatpush3.bf16.msra.mxu1 %v1933_v23 }
 0x12d   :  { %1471 = vmatprep.subr.bf16.mxu1 %v1796_v10 }
 0x130   :  { %1472 = vmatpush3.bf16.msra.mxu1 %v1940_v24 }
 0x131   :  { %1473 = vmatprep.subr.bf16.mxu1 %v1796_v10 }
 0x134   :  { %1474 = vmatpush3.bf16.msra.mxu1 %v1948_v25 }
 0x135   :  { %1505 = vmatprep.subr.bf16.mxu1 %v1796_v10 }
 0x1ea   :  { %v240_v26 = vpop.f32.mrb[0].mxu1 }
 0x1eb   :  { %v1457_v27 = vpop.f32.mrb[1].mxu1 }
 0x1ec   :  { %v243_v28 = vpop.f32.mrb[2].mxu1  ;;  %v2055_v27 = vld [vmem:[%s2245_s2 + $0x30] sm:$0xff]  }
 0x1ed   :  { %v247_v29 = vpack.c.bf16 %v243_v28, %v240_v26  ;;  %v1458_v30 = vpop.f32.mrb[3].mxu1  ;;  %v2046_v26 = vld [vmem:[%s2245_s2 + $0x28] sm:$0xff]   ;;  %v2062_v28 = vld [vmem:[%s2245_s2 + $0x38] sm:$0xff]  }
 0x1ee   :  { %v762_v30 = vld [vmem:[#allocation2 + $0x28] sm:$0xff] }
 0x1ef   :  { %1476 = vmatmul.mubr.bf16.vlgmr.msra.gmra.mrb[4].mxu1 %v247_v29  ;;  %v761_v29 = vld [vmem:[#allocation2 + $0x20] sm:$0xff] }
 0x1f0   :  { %1507 = vmatprep.mubr.msk.bf16.mxu1 %vm1797_vm1, %v1796_v10 }
 0x2c2   :  { %v330_v32 = vpop.f32.mrb[4].mxu1 }
 0x2c3   :  { %v331_v34 = vadd.f32 %v330_v32, %v1954_v31  ;;  %v1477_v35 = vpop.f32.mrb[5].mxu1  ;;  %v763_v32 = vld [vmem:[#allocation2 + $0x30] sm:$0xff] }
 0x2c4   :  { %v333_v36 = vpop.f32.mrb[6].mxu1  ;;  %v764_v35 = vld [vmem:[#allocation2 + $0x38] sm:$0xff] }
 0x2c5   :  { %v334_v37 = vadd.f32 %v333_v36, %v1956_v33  ;;  %v1478_v38 = vpop.f32.mrb[7].mxu1  ;;  %v337_v39 = vmax.f32 %v331_v34, 0.0  ;;  %v765_v34 = vpack.c.bf16 %v762_v30, %v761_v29  ;;  %v766_v36 = vpack.c.bf16 %v764_v35, %v763_v32  ;;  %v2097_v30 = vld [vmem:[%s2245_s2 + $0x40] sm:$0xff]  }
 0x2c6   :  { %v2072_v38 = vld [vmem:[#allocation5 + $0x30] sm:$0xff] }
 0x2c7   :  { %v338_v40 = vmax.f32 %v334_v37, 0.0  ;;  %v2070_v37 = vld [vmem:[#allocation5 + $0x40] sm:$0xff] }
 0x2c9   :  { %v339_v41 = vpack.c.bf16 %v338_v40, %v337_v39 }
 0x2cb   :  { %1480 = vmatpush3.bf16.msra.mxu0 %v339_v41 }
 0x2cc   :  { %1485 = vmatprep.subr.bf16.mxu0 %v1796_v10 }
 0x2ce   :  { %1482 = vmatmul.mubr.msk.bf16.vlgmr.msra.gmra.mrb[4].mxu0 %vm345_vm3, %v1963_v42 }
 0x2cf   :  { %1486 = vmatpush3.bf16.msra.mxu0 %v1894_v18  ;;  %1501 = vmatprep.mubr.msk.bf16.mxu0 %vm1797_vm1, %v1796_v10 }
 0x2d0   :  { %1487 = vmatprep.subr.bf16.mxu0 %v1796_v10 }
 0x2d3   :  { %1488 = vmatpush3.bf16.msra.mxu0 %v1903_v19 }
 0x2d4   :  { %1489 = vmatprep.subr.bf16.mxu0 %v1796_v10 }
 0x2d7   :  { %1490 = vmatpush3.bf16.msra.mxu0 %v1912_v20 }
 0x2d8   :  { %1491 = vmatprep.subr.bf16.mxu0 %v1796_v10 }
 0x2db   :  { %1492 = vmatpush3.bf16.msra.mxu0 %v1919_v21 }
 0x2dc   :  { %1493 = vmatprep.subr.bf16.mxu0 %v1796_v10 }
 0x2df   :  { %1494 = vmatpush3.bf16.msra.mxu0 %v1926_v22 }
 0x2e0   :  { %1495 = vmatprep.subr.bf16.mxu0 %v1796_v10 }
 0x2e3   :  { %1496 = vmatpush3.bf16.msra.mxu0 %v1933_v23 }
 0x2e4   :  { %1497 = vmatprep.subr.bf16.mxu0 %v1796_v10 }
 0x2e7   :  { %1498 = vmatpush3.bf16.msra.mxu0 %v1940_v24 }
 0x2e8   :  { %1499 = vmatprep.subr.bf16.mxu0 %v1796_v10 }
 0x2eb   :  { %1500 = vmatpush3.bf16.msra.mxu0 %v1948_v25 }
 0x3a1   :  { %v383_v43 = vpop.f32.mrb[4].mxu0 }
 0x3a2   :  { %v1483_v44 = vpop.f32.mrb[5].mxu0 }
 0x3a3   :  { %v386_v45 = vpop.f32.mrb[6].mxu0  ;;  %v2077_v44 = vld [vmem:[#allocation5 + $0x38] sm:$0xff] }
 0x3a4   :  { %v390_v46 = vpack.c.bf16 %v386_v45, %v383_v43  ;;  %v1484_v47 = vpop.f32.mrb[7].mxu0 }
 0x3a6   :  { %1502 = vmatmul.mubr.bf16.vlgmr.msra.gmra.mrb[8].mxu0 %v390_v46 }
 0x3a7   :  { %1533 = vmatprep.mubr.msk.bf16.mxu0 %vm345_vm3, %v2028_v7 }
 0x479   :  { %v425_v49 = vpop.f32.mrb[8].mxu0 }
 0x47a   :  { %v426_v51 = vadd.f32 %v425_v49, %v1985_v48  ;;  %v1503_v52 = vpop.f32.mrb[9].mxu0 }
 0x47b   :  { %v428_v53 = vpop.f32.mrb[10].mxu0 }
 0x47c   :  { %v432_v54 = vmax.f32 %v426_v51, 0.0  ;;  %v429_v55 = vadd.f32 %v428_v53, %v1987_v50  ;;  %v1504_v56 = vpop.f32.mrb[11].mxu0 }
 0x47d   :  { %v2082_v56 = vld [vmem:[#allocation5 + $0x60] sm:$0xff] }
 0x47e   :  { %v433_v57 = vmax.f32 %v429_v55, 0.0  ;;  %v434_v58 = vadd.f32 %v432_v54, %v337_v39 }
 0x480   :  { %v435_v59 = vadd.f32 %v433_v57, %v338_v40  ;;  %v2074_v40 = vld [vmem:[#allocation5 + $0x48] sm:$0xff] }
 0x482   :  { %v436_v60 = vpack.c.bf16 %v435_v59, %v434_v58 }
 0x484   :  { %1506 = vmatpush3.bf16.msra.mxu1 %v436_v60 }
 0x485   :  { %1511 = vmatprep.subr.bf16.mxu1 %v1796_v10 }
 0x487   :  { %1508 = vmatmul.mubr.msk.bf16.vlgmr.msra.gmra.mrb[8].mxu1 %vm345_vm3, %v1994_v61 }
 0x488   :  { %1512 = vmatpush3.bf16.msra.mxu1 %v1894_v18  ;;  %1527 = vmatprep.mubr.msk.bf16.mxu1 %vm1797_vm1, %v1796_v10 }
 0x489   :  { %1513 = vmatprep.subr.bf16.mxu1 %v1796_v10 }
 0x48c   :  { %1514 = vmatpush3.bf16.msra.mxu1 %v1903_v19 }
 0x48d   :  { %1515 = vmatprep.subr.bf16.mxu1 %v1796_v10 }
 0x490   :  { %1516 = vmatpush3.bf16.msra.mxu1 %v1912_v20 }
 0x491   :  { %1517 = vmatprep.subr.bf16.mxu1 %v1796_v10 }
 0x494   :  { %1518 = vmatpush3.bf16.msra.mxu1 %v1919_v21 }
 0x495   :  { %1519 = vmatprep.subr.bf16.mxu1 %v1796_v10 }
 0x498   :  { %1520 = vmatpush3.bf16.msra.mxu1 %v1926_v22 }
 0x499   :  { %1521 = vmatprep.subr.bf16.mxu1 %v1796_v10 }
 0x49c   :  { %1522 = vmatpush3.bf16.msra.mxu1 %v1933_v23 }
 0x49d   :  { %1523 = vmatprep.subr.bf16.mxu1 %v1796_v10 }
 0x4a0   :  { %1524 = vmatpush3.bf16.msra.mxu1 %v1940_v24 }
 0x4a1   :  { %1525 = vmatprep.subr.bf16.mxu1 %v1796_v10 }
 0x4a4   :  { %1526 = vmatpush3.bf16.msra.mxu1 %v1948_v25 }
 0x4a5   :  { %1561 = vmatprep.subr.bf16.mxu1 %v1852_v0 }
 0x55a   :  { %v479_v62 = vpop.f32.mrb[8].mxu1 }
 0x55b   :  { %v1509_v63 = vpop.f32.mrb[9].mxu1 }
 0x55c   :  { %v482_v3 = vpop.f32.mrb[10].mxu1 }
 0x55d   :  { %v486_v4 = vpack.c.bf16 %v482_v3, %v479_v62  ;;  %v1510_v5 = vpop.f32.mrb[11].mxu1  ;;  %v2086_v62 = vld [vmem:[#allocation5 + $0x68] sm:$0xff] }
 0x55f   :  { %1528 = vmatmul.mubr.bf16.vlgmr.msra.gmra.mrb[12].mxu1 %v486_v4  ;;  %v2089_v4 = vld [vmem:[#allocation5 + $0x58] sm:$0xff] }
 0x560   :  { %1562 = vmatpush3.bf16.msra.mxu1 %v1852_v0  ;;  %v2032_v0 = vld [vmem:[#allocation5 + $0x20] sm:$0xff]  ;;  %1569 = vmatprep.mubr.msk.bf16.mxu1 %vm139_vm0, %v765_v34 }
 0x561   :  { %1563 = vmatprep.subr.bf16.mxu1 %v1857_v1 }
 0x564   :  { %1564 = vmatpush3.bf16.msra.mxu1 %v1857_v1 }
 0x565   :  { %1565 = vmatprep.subr.bf16.mxu1 %v1865_v2 }
 0x568   :  { %1566 = vmatpush3.bf16.msra.mxu1 %v1865_v2 }
 0x569   :  { %1567 = vmatprep.subr.bf16.mxu1 %v1870_v6 }
 0x56c   :  { %1568 = vmatpush3.bf16.msra.mxu1 %v1870_v6 }
 0x56d   :  { %1601 = vmatprep.subr.bf16.mxu1 %v1796_v10 }
 0x56f   :  { %1570 = vmatmul.mubr.msk.bf16.vlgmr.msra.gmra.mrb[16].mxu1 %vm139_vm0, %v766_v36 }
 0x570   :  { %1603 = vmatprep.mubr.msk.bf16.mxu1 %vm1797_vm1, %v1796_v10 }
 0x632   :  { %v521_v1 = vpop.f32.mrb[12].mxu1 }
 0x633   :  { %v522_v2 = vadd.f32 %v521_v1, %v2032_v0  ;;  %v1529_v9 = vpop.f32.mrb[13].mxu1 }
 0x634   :  { %v524_v11 = vpop.f32.mrb[14].mxu1 }
 0x635   :  { %v525_v6 = vadd.f32 %v524_v11, %v2034_v8  ;;  %v1530_v12 = vpop.f32.mrb[15].mxu1  ;;  %v528_v13 = vadd.f32 %v522_v2, %v434_v58  ;;  %v2084_v58 = vld [vmem:[#allocation5 + $0x50] sm:$0xff] }
 0x637   :  { %v529_v14 = vadd.f32 %v525_v6, %v435_v59 }
 0x639   :  { %v530_v15 = vpack.c.bf16 %v529_v14, %v528_v13 }
 0x63b   :  { %1531 = vmatprep.subr.bf16.mxu0 %v530_v15 }
 0x63c   :  { %1532 = vmatpush3.bf16.msra.mxu0 %v530_v15 }
 0x63f   :  { %1534 = vmatmul.mubr.msk.bf16.vlgmr.msra.gmra.mrb[12].mxu0 %vm345_vm3, %v2041_v16 }
 0x640   :  { %1537 = vmatprep.mubr.msk.bf16.mxu0 %vm345_vm3, %v2046_v26 }
 0x642   :  { %v1571_v32 = vpop.f32.mrb[16].mxu1 }
 0x643   :  { %v807_v34 = vpop.f32.mrb[17].mxu1 }
 0x644   :  { %v1572_v35 = vpop.f32.mrb[18].mxu1 }
 0x645   :  { %v823_v36 = vpack.c.bf16 %v1572_v35, %v1571_v32 }
 0x647   :  { %1538 = vmatmul.mubr.msk.bf16.gmra.mrb[16].mxu0 %vm345_vm3, %v2055_v27 }
 0x648   :  { %1549 = vmatprep.mubr.msk.bf16.mxu0 %vm139_vm0, %v2062_v28 }
 0x712   :  { %v1535_v39 = vpop.f32.mrb[12].mxu0 }
 0x713   :  { %v606_v41 = vadd.f32 %v1535_v39, %v2070_v37  ;;  %v597_v43 = vpop.f32.mrb[13].mxu0  ;;  %v810_v39 = vpop.f32.mrb[19].mxu1 }
 0x714   :  { %v598_v45 = vadd.f32 %v597_v43, %v2072_v38  ;;  %v1536_v46 = vpop.f32.mrb[14].mxu0  ;;  %v2104_v43 = vld [vmem:[#allocation5 + $0x80] sm:$0xff] }
 0x715   :  { %v609_v47 = vadd.f32 %v1536_v46, %v2074_v40  ;;  %v600_v49 = vpop.f32.mrb[15].mxu0  ;;  %v630_v52 = vmax.f32 %v606_v41, 0.0  ;;  %v822_v41 = vpack.c.bf16 %v810_v39, %v807_v34 }
 0x716   :  { %v601_v51 = vadd.f32 %v600_v49, %v2077_v44  ;;  %v628_v54 = vmax.f32 %v598_v45, 0.0  ;;  %v2106_v45 = vld [vmem:[#allocation5 + $0x70] sm:$0xff] }
 0x717   :  { %v631_v53 = vmax.f32 %v609_v47, 0.0  ;;  %v2108_v47 = vld [vmem:[#allocation5 + $0x88] sm:$0xff] }
 0x718   :  { %v629_v55 = vmax.f32 %v601_v51, 0.0 }
 0x719   :  { %v637_v57 = vpack.c.bf16 %v631_v53, %v630_v52  ;;  %v2111_v52 = vld [vmem:[#allocation5 + $0x78] sm:$0xff] }
 0x71a   :  { %v636_v59 = vpack.c.bf16 %v629_v55, %v628_v54  ;;  %v1539_v60 = vpop.f32.mrb[16].mxu0 }
 0x71b   :  { %v622_v63 = vadd.f32 %v1539_v60, %v2082_v56  ;;  %v613_v3 = vpop.f32.mrb[17].mxu0 }
 0x71c   :  { %v614_v5 = vadd.f32 %v613_v3, %v2084_v58  ;;  %v1540_v1 = vpop.f32.mrb[18].mxu0  ;;  %1541 = vmatprep.subr.bf16.mxu0 %v636_v59 }
 0x71d   :  { %v625_v2 = vadd.f32 %v1540_v1, %v2086_v62  ;;  %v616_v9 = vpop.f32.mrb[19].mxu0  ;;  %1542 = vmatpush3.bf16.msra.mxu0 %v636_v59  ;;  %v634_v6 = vmax.f32 %v622_v63, 0.0 }
 0x71e   :  { %v617_v11 = vadd.f32 %v616_v9, %v2089_v4  ;;  %1543 = vmatprep.subr.bf16.mxu0 %v637_v57  ;;  %v632_v13 = vmax.f32 %v614_v5, 0.0  ;;  %v2120_v9 = vld [vmem:[%s2245_s2 + $0x48] sm:$0x3]  ;;  %s1798_s2 = smov 64  }
 0x71f   :  { %v635_v12 = vmax.f32 %v625_v2, 0.0 }
 0x720   :  { %v633_v14 = vmax.f32 %v617_v11, 0.0 }
 0x721   :  { %v639_v15 = vpack.c.bf16 %v635_v12, %v634_v6  ;;  %1544 = vmatpush3.bf16.msra.mxu0 %v637_v57 }
 0x722   :  { %v638_v29 = vpack.c.bf16 %v633_v14, %v632_v13 }
 0x724   :  { %1545 = vmatprep.subr.bf16.mxu0 %v638_v29 }
 0x725   :  { %1546 = vmatpush3.bf16.msra.mxu0 %v638_v29 }
 0x726   :  { %1547 = vmatprep.subr.bf16.mxu0 %v639_v15 }
 0x729   :  { %1548 = vmatpush3.bf16.msra.mxu0 %v639_v15 }
 0x72a   :  { %1553 = vmatprep.subr.bf16.mxu0 %v1796_v10 }
 0x72c   :  { %1550 = vmatmul.mubr.msk.bf16.vlgmr.msra.gmra.mrb[20].mxu0 %vm139_vm0, %v2097_v30 }
 0x72d   :  { %1557 = vmatprep.mubr.msk.bf16.mxu0 %vm1797_vm1, %v1796_v10 }
 0x7ff   :  { %v1551_v46 = vpop.f32.mrb[20].mxu0 }
 0x800   :  { %v699_v49 = vadd.f32 %v1551_v46, %v2104_v43  ;;  %v690_v51 = vpop.f32.mrb[21].mxu0 }
 0x801   :  { %v691_v53 = vadd.f32 %v690_v51, %v2106_v45  ;;  %v1552_v54 = vpop.f32.mrb[22].mxu0 }
 0x802   :  { %v702_v55 = vadd.f32 %v1552_v54, %v2108_v47  ;;  %v693_v57 = vpop.f32.mrb[23].mxu0  ;;  %v707_v60 = vmax.f32 %v699_v49, 0.0 }
 0x803   :  { %v694_v59 = vadd.f32 %v693_v57, %v2111_v52  ;;  %v705_v3 = vmax.f32 %v691_v53, 0.0 }
 0x804   :  { %v708_v63 = vmax.f32 %v702_v55, 0.0 }
 0x805   :  { %v706_v5 = vmax.f32 %v694_v59, 0.0 }
 0x806   :  { %v710_v1 = vpack.c.bf16 %v708_v63, %v707_v60 }
 0x807   :  { %v709_v2 = vpack.c.bf16 %v706_v5, %v705_v3 }
 0x809   :  { %1554 = vmatpush3.bf16.msra.mxu0 %v709_v2 }
 0x80a   :  { %1555 = vmatprep.subr.bf16.mxu0 %v1796_v10 }
 0x80d   :  { %1556 = vmatpush3.bf16.msra.mxu0 %v710_v1 }
 0x80e   :  { %1573 = vmatprep.subr.bf16.mxu0 %v1796_v10 }
 0x810   :  { %1558 = vmatmul.mubr.msk.bf16.vlgmr.msra.gmra.mrb[24].mxu0 %vm202_vm2, %v2120_v9 }
 0x811   :  { %1574 = vmatpush3.bf16.msra.mxu0 %v822_v41  ;;  %1577 = vmatprep.mubr.msk.bf16.mxu0 %vm1797_vm1, %v1796_v10 }
 0x812   :  { %1575 = vmatprep.subr.bf16.mxu0 %v1796_v10 }
 0x815   :  { %1576 = vmatpush3.bf16.msra.mxu0 %v823_v36 }
 0x816   :  { %1581 = vmatprep.subr.bf16.mxu0 %v1796_v10 }
 0x818   :  { %1578 = vmatmul.mubr.msk.bf16.vlgmr.msra.gmra.mrb[28].mxu0 %vm202_vm2, %v1889_v17 }
 0x819   :  { %1582 = vmatpush3.bf16.msra.mxu0 %v1894_v18  ;;  %1597 = vmatprep.mubr.msk.bf16.mxu0 %vm1797_vm1, %v1796_v10 }
 0x81a   :  { %1583 = vmatprep.subr.bf16.mxu0 %v1796_v10 }
 0x81d   :  { %1584 = vmatpush3.bf16.msra.mxu0 %v1903_v19 }
 0x81e   :  { %1585 = vmatprep.subr.bf16.mxu0 %v1796_v10 }
 0x821   :  { %1586 = vmatpush3.bf16.msra.mxu0 %v1912_v20 }
 0x822   :  { %1587 = vmatprep.subr.bf16.mxu0 %v1796_v10 }
 0x825   :  { %1588 = vmatpush3.bf16.msra.mxu0 %v1919_v21 }
 0x826   :  { %1589 = vmatprep.subr.bf16.mxu0 %v1796_v10 }
 0x829   :  { %1590 = vmatpush3.bf16.msra.mxu0 %v1926_v22 }
 0x82a   :  { %1591 = vmatprep.subr.bf16.mxu0 %v1796_v10 }
 0x82d   :  { %1592 = vmatpush3.bf16.msra.mxu0 %v1933_v23 }
 0x82e   :  { %1593 = vmatprep.subr.bf16.mxu0 %v1796_v10 }
 0x831   :  { %1594 = vmatpush3.bf16.msra.mxu0 %v1940_v24 }
 0x832   :  { %1595 = vmatprep.subr.bf16.mxu0 %v1796_v10 }
 0x835   :  { %1596 = vmatpush3.bf16.msra.mxu0 %v1948_v25 }
 0x836   :  { %1627 = vmatprep.subr.bf16.mxu0 %v1796_v10 }
 0x8e3   :  { %v2149_v17 = vpop.f32.mrb[24].mxu0 }
 0x8e4   :  { %v1559_v11 = vpop.f32.mrb[25].mxu0 }
 0x8e5   :  { %v751_v6 = vpop.f32.mrb[26].mxu0 }
 0x8e6   :  { %v1560_v12 = vpop.f32.mrb[27].mxu0 }
 0x8eb   :  { %v858_v13 = vpop.f32.mrb[28].mxu0 }
 0x8ec   :  { %v1579_v14 = vpop.f32.mrb[29].mxu0 }
 0x8ed   :  { %v861_v15 = vpop.f32.mrb[30].mxu0 }
 0x8ee   :  { %v865_v29 = vpack.c.bf16 %v861_v15, %v858_v13  ;;  %v1580_v32 = vpop.f32.mrb[31].mxu0 }
 0x8f0   :  { %1598 = vmatmul.mubr.bf16.vlgmr.msra.gmra.mrb[32].mxu0 %v865_v29 }
 0x8f1   :  { %1629 = vmatprep.mubr.msk.bf16.mxu0 %vm1797_vm1, %v1796_v10 }
 0x9c3   :  { %v900_v34 = vpop.f32.mrb[32].mxu0 }
 0x9c4   :  { %v901_v35 = vadd.f32 %v900_v34, %v1954_v31  ;;  %v1599_v36 = vpop.f32.mrb[33].mxu0 }
 0x9c5   :  { %v903_v39 = vpop.f32.mrb[34].mxu0 }
 0x9c6   :  { %v904_v41 = vadd.f32 %v903_v39, %v1956_v33  ;;  %v1600_v46 = vpop.f32.mrb[35].mxu0  ;;  %v907_v49 = vmax.f32 %v901_v35, 0.0 }
 0x9c8   :  { %v908_v51 = vmax.f32 %v904_v41, 0.0 }
 0x9ca   :  { %v909_v53 = vpack.c.bf16 %v908_v51, %v907_v49 }
 0x9cc   :  { %1602 = vmatpush3.bf16.msra.mxu1 %v909_v53 }
 0x9cd   :  { %1607 = vmatprep.subr.bf16.mxu1 %v1796_v10 }
 0x9cf   :  { %1604 = vmatmul.mubr.msk.bf16.vlgmr.msra.gmra.mrb[20].mxu1 %vm345_vm3, %v1963_v42 }
 0x9d0   :  { %1608 = vmatpush3.bf16.msra.mxu1 %v1894_v18  ;;  %1623 = vmatprep.mubr.msk.bf16.mxu1 %vm1797_vm1, %v1796_v10 }
 0x9d1   :  { %1609 = vmatprep.subr.bf16.mxu1 %v1796_v10 }
 0x9d4   :  { %1610 = vmatpush3.bf16.msra.mxu1 %v1903_v19 }
 0x9d5   :  { %1611 = vmatprep.subr.bf16.mxu1 %v1796_v10 }
 0x9d8   :  { %1612 = vmatpush3.bf16.msra.mxu1 %v1912_v20 }
 0x9d9   :  { %1613 = vmatprep.subr.bf16.mxu1 %v1796_v10 }
 0x9dc   :  { %1614 = vmatpush3.bf16.msra.mxu1 %v1919_v21 }
 0x9dd   :  { %1615 = vmatprep.subr.bf16.mxu1 %v1796_v10 }
 0x9e0   :  { %1616 = vmatpush3.bf16.msra.mxu1 %v1926_v22 }
 0x9e1   :  { %1617 = vmatprep.subr.bf16.mxu1 %v1796_v10 }
 0x9e4   :  { %1618 = vmatpush3.bf16.msra.mxu1 %v1933_v23 }
 0x9e5   :  { %1619 = vmatprep.subr.bf16.mxu1 %v1796_v10 }
 0x9e8   :  { %1620 = vmatpush3.bf16.msra.mxu1 %v1940_v24 }
 0x9e9   :  { %1621 = vmatprep.subr.bf16.mxu1 %v1796_v10 }
 0x9ec   :  { %1622 = vmatpush3.bf16.msra.mxu1 %v1948_v25 }
 0xaa2   :  { %v944_v31 = vpop.f32.mrb[20].mxu1 }
 0xaa3   :  { %v1605_v33 = vpop.f32.mrb[21].mxu1 }
 0xaa4   :  { %v947_v42 = vpop.f32.mrb[22].mxu1 }
 0xaa5   :  { %v951_v54 = vpack.c.bf16 %v947_v42, %v944_v31  ;;  %v1606_v55 = vpop.f32.mrb[23].mxu1 }
 0xaa7   :  { %1624 = vmatmul.mubr.bf16.vlgmr.msra.gmra.mrb[24].mxu1 %v951_v54 }
 0xaa8   :  { %1655 = vmatprep.mubr.msk.bf16.mxu1 %vm345_vm3, %v2028_v7 }
 0xb7a   :  { %v986_v57 = vpop.f32.mrb[24].mxu1 }
 0xb7b   :  { %v987_v59 = vadd.f32 %v986_v57, %v1985_v48  ;;  %v1625_v60 = vpop.f32.mrb[25].mxu1 }
 0xb7c   :  { %v989_v63 = vpop.f32.mrb[26].mxu1 }
 0xb7d   :  { %v993_v3 = vmax.f32 %v987_v59, 0.0  ;;  %v990_v5 = vadd.f32 %v989_v63, %v1987_v50  ;;  %v1626_v1 = vpop.f32.mrb[27].mxu1 }
 0xb7f   :  { %v994_v2 = vmax.f32 %v990_v5, 0.0  ;;  %v995_v11 = vadd.f32 %v993_v3, %v907_v49 }
 0xb81   :  { %v996_v6 = vadd.f32 %v994_v2, %v908_v51 }
 0xb83   :  { %v997_v12 = vpack.c.bf16 %v996_v6, %v995_v11 }
 0xb85   :  { %1628 = vmatpush3.bf16.msra.mxu0 %v997_v12 }
 0xb86   :  { %1633 = vmatprep.subr.bf16.mxu0 %v1796_v10 }
 0xb88   :  { %1630 = vmatmul.mubr.msk.bf16.vlgmr.msra.gmra.mrb[36].mxu0 %vm345_vm3, %v1994_v61 }
 0xb89   :  { %1634 = vmatpush3.bf16.msra.mxu0 %v1894_v18  ;;  %1649 = vmatprep.mubr.msk.bf16.mxu0 %vm1797_vm1, %v1796_v10 }
 0xb8a   :  { %1635 = vmatprep.subr.bf16.mxu0 %v1796_v10 }
 0xb8d   :  { %1636 = vmatpush3.bf16.msra.mxu0 %v1903_v19 }
 0xb8e   :  { %1637 = vmatprep.subr.bf16.mxu0 %v1796_v10 }
 0xb91   :  { %1638 = vmatpush3.bf16.msra.mxu0 %v1912_v20 }
 0xb92   :  { %1639 = vmatprep.subr.bf16.mxu0 %v1796_v10 }
 0xb95   :  { %1640 = vmatpush3.bf16.msra.mxu0 %v1919_v21 }
 0xb96   :  { %1641 = vmatprep.subr.bf16.mxu0 %v1796_v10 }
 0xb99   :  { %1642 = vmatpush3.bf16.msra.mxu0 %v1926_v22 }
 0xb9a   :  { %1643 = vmatprep.subr.bf16.mxu0 %v1796_v10 }
 0xb9d   :  { %1644 = vmatpush3.bf16.msra.mxu0 %v1933_v23 }
 0xb9e   :  { %1645 = vmatprep.subr.bf16.mxu0 %v1796_v10 }
 0xba1   :  { %1646 = vmatpush3.bf16.msra.mxu0 %v1940_v24 }
 0xba2   :  { %1647 = vmatprep.subr.bf16.mxu0 %v1796_v10 }
 0xba5   :  { %1648 = vmatpush3.bf16.msra.mxu0 %v1948_v25 }
 0xc5b   :  { %v1032_v18 = vpop.f32.mrb[36].mxu0 }
 0xc5c   :  { %v1631_v19 = vpop.f32.mrb[37].mxu0 }
 0xc5d   :  { %v1035_v20 = vpop.f32.mrb[38].mxu0 }
 0xc5e   :  { %v1039_v21 = vpack.c.bf16 %v1035_v20, %v1032_v18  ;;  %v1632_v48 = vpop.f32.mrb[39].mxu0 }
 0xc60   :  { %1650 = vmatmul.mubr.bf16.vlgmr.msra.gmra.mrb[40].mxu0 %v1039_v21 }
 0xd33   :  { %v1074_v50 = vpop.f32.mrb[40].mxu0 }
 0xd34   :  { %v1075_v22 = vadd.f32 %v1074_v50, %v2032_v0  ;;  %v1651_v61 = vpop.f32.mrb[41].mxu0 }
 0xd35   :  { %v1077_v7 = vpop.f32.mrb[42].mxu0 }
 0xd36   :  { %v1078_v23 = vadd.f32 %v1077_v7, %v2034_v8  ;;  %v1652_v13 = vpop.f32.mrb[43].mxu0  ;;  %v1081_v14 = vadd.f32 %v1075_v22, %v995_v11 }
 0xd38   :  { %v1082_v24 = vadd.f32 %v1078_v23, %v996_v6 }
 0xd3a   :  { %v1083_v15 = vpack.c.bf16 %v1082_v24, %v1081_v14 }
 0xd3c   :  { %1653 = vmatprep.subr.bf16.mxu1 %v1083_v15 }
 0xd3d   :  { %1654 = vmatpush3.bf16.msra.mxu1 %v1083_v15 }
 0xd40   :  { %1656 = vmatmul.mubr.msk.bf16.vlgmr.msra.gmra.mrb[28].mxu1 %vm345_vm3, %v2041_v16 }
 0xd41   :  { %1659 = vmatprep.mubr.msk.bf16.mxu1 %vm345_vm3, %v2046_v26 }
 0xd48   :  { %1660 = vmatmul.mubr.msk.bf16.gmra.mrb[32].mxu1 %vm345_vm3, %v2055_v27 }
 0xd49   :  { %1671 = vmatprep.mubr.msk.bf16.mxu1 %vm139_vm0, %v2062_v28 }
 0xe13   :  { %v1657_v25 = vpop.f32.mrb[28].mxu1 }
 0xe14   :  { %v1127_v0 = vadd.f32 %v1657_v25, %v2070_v37  ;;  %v1118_v8 = vpop.f32.mrb[29].mxu1 }
 0xe15   :  { %v1119_v29 = vadd.f32 %v1118_v8, %v2072_v38  ;;  %v1658_v32 = vpop.f32.mrb[30].mxu1 }
 0xe16   :  { %v1130_v34 = vadd.f32 %v1658_v32, %v2074_v40  ;;  %v1121_v35 = vpop.f32.mrb[31].mxu1  ;;  %v1151_v36 = vmax.f32 %v1127_v0, 0.0 }
 0xe17   :  { %v1122_v16 = vadd.f32 %v1121_v35, %v2077_v44  ;;  %v1149_v39 = vmax.f32 %v1119_v29, 0.0 }
 0xe18   :  { %v1152_v26 = vmax.f32 %v1130_v34, 0.0 }
 0xe19   :  { %v1150_v41 = vmax.f32 %v1122_v16, 0.0 }
 0xe1a   :  { %v1158_v27 = vpack.c.bf16 %v1152_v26, %v1151_v36 }
 0xe1b   :  { %v1157_v46 = vpack.c.bf16 %v1150_v41, %v1149_v39  ;;  %v1661_v49 = vpop.f32.mrb[32].mxu1 }
 0xe1c   :  { %v1143_v28 = vadd.f32 %v1661_v49, %v2082_v56  ;;  %v1134_v51 = vpop.f32.mrb[33].mxu1 }
 0xe1d   :  { %v1135_v37 = vadd.f32 %v1134_v51, %v2084_v58  ;;  %v1662_v53 = vpop.f32.mrb[34].mxu1  ;;  %1663 = vmatprep.subr.bf16.mxu1 %v1157_v46 }
 0xe1e   :  { %v1146_v38 = vadd.f32 %v1662_v53, %v2086_v62  ;;  %v1137_v40 = vpop.f32.mrb[35].mxu1  ;;  %1664 = vmatpush3.bf16.msra.mxu1 %v1157_v46  ;;  %v1155_v31 = vmax.f32 %v1143_v28, 0.0 }
 0xe1f   :  { %v1138_v44 = vadd.f32 %v1137_v40, %v2089_v4  ;;  %1665 = vmatprep.subr.bf16.mxu1 %v1158_v27  ;;  %v1153_v42 = vmax.f32 %v1135_v37, 0.0 }
 0xe20   :  { %v1156_v33 = vmax.f32 %v1146_v38, 0.0 }
 0xe21   :  { %v1154_v54 = vmax.f32 %v1138_v44, 0.0 }
 0xe22   :  { %v1160_v55 = vpack.c.bf16 %v1156_v33, %v1155_v31  ;;  %1666 = vmatpush3.bf16.msra.mxu1 %v1158_v27 }
 0xe23   :  { %v1159_v57 = vpack.c.bf16 %v1154_v54, %v1153_v42 }
 0xe25   :  { %1667 = vmatprep.subr.bf16.mxu1 %v1159_v57 }
 0xe26   :  { %1668 = vmatpush3.bf16.msra.mxu1 %v1159_v57 }
 0xe27   :  { %1669 = vmatprep.subr.bf16.mxu1 %v1160_v55 }
 0xe2a   :  { %1670 = vmatpush3.bf16.msra.mxu1 %v1160_v55 }
 0xe2b   :  { %1675 = vmatprep.subr.bf16.mxu1 %v1796_v10 }
 0xe2d   :  { %1672 = vmatmul.mubr.msk.bf16.vlgmr.msra.gmra.mrb[36].mxu1 %vm139_vm0, %v2097_v30 }
 0xe2e   :  { %1679 = vmatprep.mubr.msk.bf16.mxu1 %vm1797_vm1, %v1796_v10 }
 0xf00   :  { %v1673_v56 = vpop.f32.mrb[36].mxu1 }
 0xf01   :  { %v1204_v58 = vadd.f32 %v1673_v56, %v2104_v43  ;;  %v1195_v62 = vpop.f32.mrb[37].mxu1  ;;  %v108_v43 = vld [vmem:[#allocation5 + $0x90] sm:$0xf] }
 0xf02   :  { %v1196_v4 = vadd.f32 %v1195_v62, %v2106_v45  ;;  %v1674_v59 = vpop.f32.mrb[38].mxu1 }
 0xf03   :  { %v1207_v60 = vadd.f32 %v1674_v59, %v2108_v47  ;;  %v1198_v63 = vpop.f32.mrb[39].mxu1  ;;  %v1212_v5 = vmax.f32 %v1204_v58, 0.0 }
 0xf04   :  { %v1199_v3 = vadd.f32 %v1198_v63, %v2111_v52  ;;  %v1210_v2 = vmax.f32 %v1196_v4, 0.0 }
 0xf05   :  { %v1213_v1 = vmax.f32 %v1207_v60, 0.0 }
 0xf06   :  { %v1211_v11 = vmax.f32 %v1199_v3, 0.0 }
 0xf07   :  { %v1215_v30 = vpack.c.bf16 %v1213_v1, %v1212_v5 }
 0xf08   :  { %v1214_v6 = vpack.c.bf16 %v1211_v11, %v1210_v2 }
 0xf0a   :  { %1676 = vmatpush3.bf16.msra.mxu1 %v1214_v6 }
 0xf0b   :  { %1677 = vmatprep.subr.bf16.mxu1 %v1796_v10  ;;  %v749_v10 = vadd.f32 %v2149_v17, %v108_v43 }
 0xf0d   :  { %v1317_v50 = vmul.f32 -1.442695, %v749_v10 }
 0xf0e   :  { %1678 = vmatpush3.bf16.msra.mxu1 %v1215_v30 }
 0xf11   :  { %1680 = vmatmul.mubr.msk.bf16.vlgmr.msra.gmra.mrb[40].mxu1 %vm202_vm2, %v2120_v9 }
 0xfe4   :  { %v1250_v45 = vpop.f32.mrb[40].mxu1 }
 0xfe5   :  { %v1251_v12 = vadd.f32 %v1250_v45, %v108_v43  ;;  %v1681_v47 = vpop.f32.mrb[41].mxu1 }
 0xfe6   :  { %v1253_v18 = vpop.f32.mrb[42].mxu1 }
 0xfe7   :  { %v1330_v19 = vmul.f32 -1.442695, %v1251_v12  ;;  %v1682_v52 = vpop.f32.mrb[43].mxu1 }
 0xfe9   :  { %1712 = vpow2.f32 %v1330_v19 }
 0xff3   :  { %v1713_v20 = vpop.eup %1712 }
 0xff4   :  { %v1259_v21 = vadd.f32 1.0, %v1713_v20 }
 0xff6   :  { %1714 = vrcp.f32 %v1259_v21 }
 0xff7   :  { %1716 = vpow2.f32 %v1317_v50 }
0x1000   :  { %v1715_v48 = vpop.eup %1714 }
0x1001   :  { %1263 = vrot.lane.b32.xlu0 %v1715_v48, %s1798_s2  ;;  %v1717_v22 = vpop.eup %1716 }
0x1002   :  { %v757_v9 = vadd.f32 1.0, %v1717_v22 }
0x1004   :  { %1718 = vrcp.f32 %v757_v9 }
0x100e   :  { %v1719_v61 = vpop.eup %1718 }
0x1073   :  { %v1264_v7 = vpop.permute.xlu0 %1263 }
0x1074   :  { %v1266_v23 = vsel %vm139_vm0, %v1719_v61, %v1264_v7 }
0x1075   :  { %1267 = vst [vmem:[#allocation7] sm:$0xf] %v1266_v23 }
0x1076   :  { %1775 = shalt.err (!%p1772_p6)
}
0x1077   :  { %s1776_s7 = scalar_lea.hbm %s2247_s4, 64 }
0x1078   :  { %p1777_p7 = scmp.ne.s32.totalorder %s2247_s4, %s1776_s7  ;;  %p1780_p8 = scmp.lt.u32.totalorder %s1776_s7, %s2247_s4 }
0x107a   :  { %p1782_p9 = pnand %p1780_p8, %p1777_p7 }
0x107c   :  { %1785 = shalt.err (!%p1782_p9)
}
0x107d   :  { %1277 = dma.vmem_to_hbm [thread:$0]  %s1275_s29, 64, %s2247_s4, [#allocation4]  }
0x107e   :  { %1790 = dma.done.wait [#allocation4], 64  }
0x107f   :  { %1791 = vsyncadd [#allocation4], 4294967232 }
0x1080   :  { %1281 = vsyncpa [#allocation3], 1 }
0x1081   :  { %1282 = vsyncpa [#allocation6], 1 }
0x1082   :  { %1283 = vsyncpa [#allocation4], 1 }

</bundles_post_ra>
